<compile_context>
chip_gen: v6e
topology: v6e:2x2x1
jax: 0.10.0
libtpu: 0.0.40
codegen_flags: <defaults>
</compile_context>

<pallas_src>
import functools

import jax
import jax.numpy as jnp
from jax.experimental import pallas as pl
from jax.experimental.pallas import tpu as pltpu

GAMMA = 2.0          # module default (specialized below: integer power -> multiply)
SIZE_AVERAGE = True  # module default


def _focal_loss_kernel(x_ref, t_ref, a_ref, o_ref, acc_ref, *,
                       n_total, tile_n, steps_per_slice, needs_mask):
    i = pl.program_id(1)                              # step within this batch slice

    @pl.when(i == 0)
    def _init():
        acc_ref[...] = jnp.zeros_like(acc_ref)

    x = x_ref[...].astype(jnp.float32)                # (C, tile_n) logits, batch on lanes
    t = t_ref[...]                                    # (1, tile_n) int32 targets
    a = a_ref[...]                                    # (C, 1) float32 alpha

    # One-hot target mask via class-iota (sublane axis) == target (replaces scatter_).
    cls = jax.lax.broadcasted_iota(jnp.int32, x.shape, 0)
    onehot = (cls == t).astype(jnp.float32)           # (C, tile_n)

    # log-softmax over the class (sublane) axis: numerically safe, no full divide.
    m = jnp.max(x, axis=0, keepdims=True)             # (1, tile_n)
    s = x - m
    es = jnp.exp(s)                                   # (C, tile_n)
    sum_exp = jnp.sum(es, axis=0, keepdims=True)      # (1, tile_n), >= 1
    lse = jnp.log(sum_exp)
    x_t = jnp.sum(s * onehot, axis=0, keepdims=True)  # x[target] - m
    log_p = x_t - lse                                 # log p_t
    # Reuse exp(s) for p_t instead of a second per-row exp.
    p_t = jnp.sum(es * onehot, axis=0, keepdims=True) / sum_exp
    a_t = jnp.sum(a * onehot, axis=0, keepdims=True)  # alpha[target]

    one_minus_p = 1.0 - p_t
    # gamma == 2: explicit square instead of jnp.power.
    loss = -a_t * (one_minus_p * one_minus_p) * log_p  # (1, tile_n)

    def _accum(l):
        acc_ref[...] = acc_ref[...] + l

    if needs_mask:
        # Only edge tiles (partial or fully out-of-range) pay the mask cost.
        step = pl.program_id(0) * steps_per_slice + i  # global batch-tile index
        is_edge = (step + 1) * tile_n > n_total

        @pl.when(is_edge)
        def _masked():
            lane = jax.lax.broadcasted_iota(jnp.int32, loss.shape, 1)
            valid = step * tile_n + lane < n_total
            _accum(jnp.where(valid, loss, 0.0))

        @pl.when(jnp.logical_not(is_edge))
        def _fast():
            _accum(loss)
    else:
        _accum(loss)

    @pl.when(i == pl.num_programs(1) - 1)
    def _finalize():
        # Single cross-lane reduction per slice; lane-dense (8,128) output store.
        o_ref[...] = jnp.full(o_ref.shape, jnp.sum(acc_ref[...]), jnp.float32)


def focal_loss(inputs, targets, alpha, *, tile_n=64 * 1024, num_slices=2):
    """inputs: (N, C) float logits; targets: (N,) int; alpha: (C,) float.
    Returns scalar loss matching FocalLoss(gamma=2, size_average=True)."""
    n, c = inputs.shape
    # Lane-dense layout: batch on the 128-lane axis, classes on sublanes.
    x_cn = inputs.T                                    # (C, N)
    t2d = targets.astype(jnp.int32).reshape(1, n)      # (1, N)
    a2d = alpha.astype(jnp.float32).reshape(c, 1)      # (C, 1)

    # Lane tile must be a multiple of 128; cap at (lane-padded) N.
    tn = min(tile_n, ((n + 127) // 128) * 128)
    total_steps = pl.cdiv(n, tn)
    slices = max(1, min(num_slices, total_steps))      # leading "parallel" axis
    steps_per_slice = pl.cdiv(total_steps, slices)
    last_block = total_steps - 1
    # Static gate: if the grid covers exactly N, skip all per-lane masking.
    needs_mask = slices * steps_per_slice * tn != n

    def batch_idx(s, i):
        # Clamp so out-of-range steps of an uneven split re-read the last valid
        # block (their contribution is fully masked to zero in the kernel).
        return (0, jnp.minimum(s * steps_per_slice + i, last_block))

    kernel = functools.partial(
        _focal_loss_kernel, n_total=n, tile_n=tn,
        steps_per_slice=steps_per_slice, needs_mask=needs_mask)

    cost = pl.CostEstimate(
        flops=10 * n * c,
        transcendentals=n * c + n,                     # exp per element + log per row
        bytes_accessed=(n * c * inputs.dtype.itemsize + n * 4 + c * 4
                        + slices * 8 * 128 * 4),
    )

    out = pl.pallas_call(
        kernel,
        out_shape=jax.ShapeDtypeStruct((slices * 8, 128), jnp.float32),
        grid=(slices, steps_per_slice),
        in_specs=[
            pl.BlockSpec((c, tn), batch_idx),          # logits tile (C x lanes)
            pl.BlockSpec((1, tn), batch_idx),          # targets tile, lane-dense
            pl.BlockSpec((c, 1), lambda s, i: (0, 0)),  # alpha, constant block
        ],
        out_specs=pl.BlockSpec((8, 128), lambda s, i: (s, 0)),  # per-slice partial
        scratch_shapes=[pltpu.VMEM((1, tn), jnp.float32)],      # per-lane running sum
        compiler_params=pltpu.CompilerParams(
            dimension_semantics=("parallel", "arbitrary"),  # slices -> TCs; steps carry acc
            vmem_limit_bytes=48 * 1024 * 1024,              # v7x-safe headroom
        ),
        cost_estimate=cost,
    )(x_cn, t2d, a2d)

    partial_sums = out.reshape(slices, 8, 128)[:, 0, 0]
    total = jnp.sum(partial_sums)
    if SIZE_AVERAGE:
        return total / jnp.float32(n)
    return total


def _reference(logits, targets, alpha):
    p = jax.nn.softmax(logits.astype(jnp.float32), axis=1)
    p_t = p[jnp.arange(logits.shape[0]), targets]
    a_t = alpha[targets]
    per_row = -a_t * (1.0 - p_t) ** GAMMA * jnp.log(p_t)
    return jnp.mean(per_row) if SIZE_AVERAGE else jnp.sum(per_row)


if __name__ == "__main__":
    # class_num = 11, matching the module-level alpha tensor.
    alpha = jnp.array([1, 2.3, 0.66, 1, 1.1, 0.75, 2.3, 3.5, 1.1, 0.66, 1.4],
                      dtype=jnp.float32)
    class_num = alpha.shape[0]

    key = jax.random.PRNGKey(0)
    k1, k2, k3, k4 = jax.random.split(key, 4)

    # Test 1: tiny batch (N=8 < 128-lane tile) -> single step, masked edge path.
    logits = jax.random.normal(k1, (8, class_num), dtype=jnp.float32)
    targets = jax.random.randint(k2, (8,), 0, class_num, dtype=jnp.int32)
    loss = focal_loss(logits, targets, alpha)
    jax.block_until_ready(loss)
    ref = _reference(logits, targets, alpha)
    assert jnp.allclose(loss, ref, rtol=1e-5, atol=1e-6), (loss, ref)

    # Test 2: multi-step grid + 2-way parallel batch split + partial and fully
    # out-of-range tiles (N=300, tile=128 -> 3 logical steps as 2 slices x 2).
    logits2 = jax.random.normal(k3, (300, class_num), dtype=jnp.float32)
    targets2 = jax.random.randint(k4, (300,), 0, class_num, dtype=jnp.int32)
    loss2 = focal_loss(logits2, targets2, alpha, tile_n=128)
    jax.block_until_ready(loss2)
    ref2 = _reference(logits2, targets2, alpha)
    assert jnp.allclose(loss2, ref2, rtol=1e-5, atol=1e-6), (loss2, ref2)

    print("KERNEL_OK")
</pallas_src>

<mosaic_0001>
module attributes {stable_mosaic.version = 11 : i64} {
  func.func @_focal_loss_kernel(%arg0: i32, %arg1: i32, %arg2: memref<11x128xf32, #tpu.memory_space<vmem>>, %arg3: memref<1x128xi32, #tpu.memory_space<vmem>>, %arg4: memref<11x1xf32, #tpu.memory_space<vmem>>, %arg5: memref<8x128xf32, #tpu.memory_space<vmem>>, %arg6: memref<1x128xf32, #tpu.memory_space<vmem>>) attributes {dimension_semantics = [#tpu.dimension_semantics<parallel>, #tpu.dimension_semantics<arbitrary>], iteration_bounds = array<i64: 1, 1>, scalar_prefetch = 0 : i64, scratch_operands = 1 : i64, tpu.core_type = #tpu.core_type<tc>, window_params = [{transform_indices = @transform_0, window_bounds = array<i64: 11, 128>}, {transform_indices = @transform_1, window_bounds = array<i64: 1, 128>}, {pipeline_mode = #tpu.pipeline_mode<synchronous>, transform_indices = @transform_2, window_bounds = array<i64: 11, 1>}, {transform_indices = @transform_3, window_bounds = array<i64: 8, 128>}]} {
    %c0_i32 = arith.constant 0 : i32
    %0 = arith.cmpi eq, %arg1, %c0_i32 : i32
    %1 = arith.extui %0 : i1 to i32
    %c0_i32_0 = arith.constant 0 : i32
    %2 = arith.cmpi ne, %1, %c0_i32_0 : i32
    scf.if %2 {
      %cst_17 = arith.constant 0.000000e+00 : f32
      %51 = vector.broadcast %cst_17 : f32 to vector<1x128xf32>
      %c0_18 = arith.constant 0 : index
      %c0_19 = arith.constant 0 : index
      %52 = vector.load %arg6[%c0_18, %c0_19] : memref<1x128xf32, #tpu.memory_space<vmem>>, vector<1x128xf32>
      tpu.vector_store %arg6[%c0_18, %c0_19], %51 {strides = array<i32>} : memref<1x128xf32, #tpu.memory_space<vmem>>, vector<1x128xf32>,
    } else {
    }
    %c0 = arith.constant 0 : index
    %c0_1 = arith.constant 0 : index
    %3 = vector.load %arg2[%c0, %c0_1] : memref<11x128xf32, #tpu.memory_space<vmem>>, vector<11x128xf32>
    %c0_2 = arith.constant 0 : index
    %c0_3 = arith.constant 0 : index
    %4 = vector.load %arg3[%c0_2, %c0_3] : memref<1x128xi32, #tpu.memory_space<vmem>>, vector<1x128xi32>
    %c0_4 = arith.constant 0 : index
    %c0_5 = arith.constant 0 : index
    %5 = vector.load %arg4[%c0_4, %c0_5] : memref<11x1xf32, #tpu.memory_space<vmem>>, vector<11x1xf32>
    %6 = tpu.iota {dimensions = array<i32: 0>} : vector<11x128xi32>
    %7 = vector.broadcast %4 : vector<1x128xi32> to vector<11x128xi32>
    %8 = arith.cmpi eq, %6, %7 : vector<11x128xi32>
    %9 = arith.extui %8 : vector<11x128xi1> to vector<11x128xi32>
    %10 = arith.sitofp %9 : vector<11x128xi32> to vector<11x128xf32>
    %cst = arith.constant dense<0xFF800000> : vector<128xf32>
    %11 = vector.multi_reduction <maximumf>, %3, %cst [0] : vector<11x128xf32> to vector<128xf32>
    %12 = vector.shape_cast %11 : vector<128xf32> to vector<1x128xf32>
    %13 = vector.broadcast %12 : vector<1x128xf32> to vector<11x128xf32>
    %14 = arith.subf %3, %13 : vector<11x128xf32>
    %15 = math.exp %14 : vector<11x128xf32>
    %cst_6 = arith.constant dense<0.000000e+00> : vector<128xf32>
    %16 = vector.multi_reduction <add>, %15, %cst_6 [0] : vector<11x128xf32> to vector<128xf32>
    %17 = vector.shape_cast %16 : vector<128xf32> to vector<1x128xf32>
    %18 = math.log %17 : vector<1x128xf32>
    %19 = arith.mulf %14, %10 : vector<11x128xf32>
    %cst_7 = arith.constant dense<0.000000e+00> : vector<128xf32>
    %20 = vector.multi_reduction <add>, %19, %cst_7 [0] : vector<11x128xf32> to vector<128xf32>
    %21 = vector.shape_cast %20 : vector<128xf32> to vector<1x128xf32>
    %22 = arith.subf %21, %18 : vector<1x128xf32>
    %23 = arith.mulf %15, %10 : vector<11x128xf32>
    %cst_8 = arith.constant dense<0.000000e+00> : vector<128xf32>
    %24 = vector.multi_reduction <add>, %23, %cst_8 [0] : vector<11x128xf32> to vector<128xf32>
    %25 = vector.shape_cast %24 : vector<128xf32> to vector<1x128xf32>
    %26 = arith.divf %25, %17 : vector<1x128xf32>
    %27 = vector.broadcast %5 : vector<11x1xf32> to vector<11x128xf32>
    %28 = arith.mulf %27, %10 : vector<11x128xf32>
    %cst_9 = arith.constant dense<0.000000e+00> : vector<128xf32>
    %29 = vector.multi_reduction <add>, %28, %cst_9 [0] : vector<11x128xf32> to vector<128xf32>
    %30 = vector.shape_cast %29 : vector<128xf32> to vector<1x128xf32>
    %cst_10 = arith.constant 1.000000e+00 : f32
    %31 = vector.broadcast %cst_10 : f32 to vector<1x128xf32>
    %32 = arith.subf %31, %26 : vector<1x128xf32>
    %cst_11 = arith.constant 0.000000e+00 : f32
    %33 = vector.broadcast %cst_11 : f32 to vector<1x128xf32>
    %34 = arith.subf %33, %30 : vector<1x128xf32>
    %35 = arith.mulf %32, %32 : vector<1x128xf32>
    %36 = arith.mulf %34, %35 : vector<1x128xf32>
    %37 = arith.mulf %36, %22 : vector<1x128xf32>
    %c1_i32 = arith.constant 1 : i32
    %38 = arith.muli %arg0, %c1_i32 : i32
    %39 = arith.addi %38, %arg1 : i32
    %c1_i32_12 = arith.constant 1 : i32
    %40 = arith.addi %39, %c1_i32_12 : i32
    %c128_i32 = arith.constant 128 : i32
    %41 = arith.muli %40, %c128_i32 : i32
    %c8_i32 = arith.constant 8 : i32
    %42 = arith.cmpi sgt, %41, %c8_i32 : i32
    %43 = arith.extui %42 : i1 to i32
    %c0_i32_13 = arith.constant 0 : i32
    %44 = arith.cmpi ne, %43, %c0_i32_13 : i32
    scf.if %44 {
      %51 = tpu.iota {dimensions = array<i32: 1>} : vector<1x128xi32>
      %c128_i32_17 = arith.constant 128 : i32
      %52 = arith.muli %39, %c128_i32_17 : i32
      %53 = vector.broadcast %52 : i32 to vector<1x128xi32>
      %54 = arith.addi %53, %51 : vector<1x128xi32>
      %c8_i32_18 = arith.constant 8 : i32
      %55 = vector.broadcast %c8_i32_18 : i32 to vector<1x128xi32>
      %56 = arith.cmpi slt, %54, %55 : vector<1x128xi32>
      %cst_19 = arith.constant 0.000000e+00 : f32
      %57 = vector.broadcast %cst_19 : f32 to vector<1x128xf32>
      %58 = arith.select %56, %37, %57 : vector<1x128xi1>, vector<1x128xf32>
      %c0_20 = arith.constant 0 : index
      %c0_21 = arith.constant 0 : index
      %59 = vector.load %arg6[%c0_20, %c0_21] : memref<1x128xf32, #tpu.memory_space<vmem>>, vector<1x128xf32>
      %60 = arith.addf %59, %58 : vector<1x128xf32>
      %c0_22 = arith.constant 0 : index
      %c0_23 = arith.constant 0 : index
      %61 = vector.load %arg6[%c0_22, %c0_23] : memref<1x128xf32, #tpu.memory_space<vmem>>, vector<1x128xf32>
      tpu.vector_store %arg6[%c0_22, %c0_23], %60 {strides = array<i32>} : memref<1x128xf32, #tpu.memory_space<vmem>>, vector<1x128xf32>,
    } else {
    }
    %true = arith.constant true
    %45 = arith.xori %42, %true : i1
    %46 = arith.extui %45 : i1 to i32
    %c0_i32_14 = arith.constant 0 : i32
    %47 = arith.cmpi ne, %46, %c0_i32_14 : i32
    scf.if %47 {
      %c0_17 = arith.constant 0 : index
      %c0_18 = arith.constant 0 : index
      %51 = vector.load %arg6[%c0_17, %c0_18] : memref<1x128xf32, #tpu.memory_space<vmem>>, vector<1x128xf32>
      %52 = arith.addf %51, %37 : vector<1x128xf32>
      %c0_19 = arith.constant 0 : index
      %c0_20 = arith.constant 0 : index
      %53 = vector.load %arg6[%c0_19, %c0_20] : memref<1x128xf32, #tpu.memory_space<vmem>>, vector<1x128xf32>
      tpu.vector_store %arg6[%c0_19, %c0_20], %52 {strides = array<i32>} : memref<1x128xf32, #tpu.memory_space<vmem>>, vector<1x128xf32>,
    } else {
    }
    %c0_i32_15 = arith.constant 0 : i32
    %48 = arith.cmpi eq, %arg1, %c0_i32_15 : i32
    %49 = arith.extui %48 : i1 to i32
    %c0_i32_16 = arith.constant 0 : i32
    %50 = arith.cmpi ne, %49, %c0_i32_16 : i32
    scf.if %50 {
      %c0_17 = arith.constant 0 : index
      %c0_18 = arith.constant 0 : index
      %51 = vector.load %arg6[%c0_17, %c0_18] : memref<1x128xf32, #tpu.memory_space<vmem>>, vector<1x128xf32>
      %52 = vector.shape_cast %51 : vector<1x128xf32> to vector<1x1x128xf32>
      %cst_19 = arith.constant dense<0.000000e+00> : vector<1xf32>
      %53 = vector.multi_reduction <add>, %52, %cst_19 [1, 2] : vector<1x1x128xf32> to vector<1xf32>
      %54 = vector.shape_cast %53 : vector<1xf32> to vector<1x1x1xf32>
      %55 = vector.extract %54[0, 0, 0] : f32 from vector<1x1x1xf32>
      %56 = vector.broadcast %55 : f32 to vector<8x128xf32>
      %c0_20 = arith.constant 0 : index
      %c0_21 = arith.constant 0 : index
      %57 = vector.load %arg5[%c0_20, %c0_21] : memref<8x128xf32, #tpu.memory_space<vmem>>, vector<8x128xf32>
      tpu.vector_store %arg5[%c0_20, %c0_21], %56 {strides = array<i32>} : memref<8x128xf32, #tpu.memory_space<vmem>>, vector<8x128xf32>,
    } else {
    }
    return
  }
  func.func @transform_0(%arg0: i32, %arg1: i32) -> (i32, i32) {
    %c1_i32 = arith.constant 1 : i32
    %0 = arith.muli %arg0, %c1_i32 : i32
    %1 = arith.addi %0, %arg1 : i32
    %c0_i32 = arith.constant 0 : i32
    %2 = arith.minsi %1, %c0_i32 : i32
    %c0_i32_0 = arith.constant 0 : i32
    %c0_i32_1 = arith.constant 0 : i32
    return %c0_i32_0, %2 : i32, i32
  }
  func.func @transform_1(%arg0: i32, %arg1: i32) -> (i32, i32) {
    %c1_i32 = arith.constant 1 : i32
    %0 = arith.muli %arg0, %c1_i32 : i32
    %1 = arith.addi %0, %arg1 : i32
    %c0_i32 = arith.constant 0 : i32
    %2 = arith.minsi %1, %c0_i32 : i32
    %c0_i32_0 = arith.constant 0 : i32
    %c0_i32_1 = arith.constant 0 : i32
    return %c0_i32_0, %2 : i32, i32
  }
  func.func @transform_2(%arg0: i32, %arg1: i32) -> (i32, i32) {
    %c0_i32 = arith.constant 0 : i32
    %c0_i32_0 = arith.constant 0 : i32
    %c0_i32_1 = arith.constant 0 : i32
    return %c0_i32, %c0_i32_0 : i32, i32
  }
  func.func @transform_3(%arg0: i32, %arg1: i32) -> (i32, i32) {
    %c0_i32 = arith.constant 0 : i32
    %c0_i32_0 = arith.constant 0 : i32
    return %arg0, %c0_i32 : i32, i32
  }
}

</mosaic_0001>

<bundles_post_ra>
// kernel: tpu_custom_call.1
= control target key start
LH: loop header
LB: loop body
LE: loop exit
PB: predicated region body
PF: predicated region fallthrough
CT: control target
= control target key end

     0   :  { %v265_v1 = vmov 0   ;;  %v266_v2 = vmov 0.0   ;;  %s311_s0 = inlined_call_operand.vmem [shape: f32[11,8], index: 0, kind: input, shape index: {}]   ;;  %s312_s1 = inlined_call_operand.vmem [shape: s32[1,8], index: 1, kind: input, shape index: {}]   ;;  %s313_s2 = inlined_call_operand.vmem [shape: f32[11,1], index: 2, kind: input, shape index: {}]   ;;  %s314_s3 = inlined_call_operand.hbm [shape: f32[8,128], index: 3, kind: output, shape index: {}]  }
   0x1   :  { %v75_v0 = vld [vmem:[%s313_s2 + $0x8] sm:$0x7]  ;;  %234 = vset.pattern.permute.xlu0 %v265_v1  ;;  %70 = vst [vmem:[#allocation2] sm:$0x1] %v266_v2 }
   0x2   :  { %144 = vperm.xlu0 %234, %v75_v0  }
   0x3   :  { %8 = vsyncpa [#allocation4], 0  ;;  %v74_v3 = vld [vmem:[%s313_s2] sm:$0xff]  ;;  %vm89_vm0 = vcmask 1042432   ;;  %v72_v4 = vld [vmem:[%s311_s0 + $0x8] sm:$0x7]  ;;  %v76_v18 = vlaneseq }
   0x4   :  { %v71_v5 = vld [vmem:[%s311_s0] sm:$0xff]  ;;  %v90_v6 = vsel %vm89_vm0, %v72_v4, -inf  ;;  %vm190_vm4 = vcmask 1040384  }
   0x5   :  { %v91_v7 = vmax.f32 %v71_v5, %v90_v6  ;;  %v77_v20 = vshrl.u32 %v76_v18, 7  ;;  %v226_v24 = vld [vmem:[%s312_s1] ss:$0 sm:$0xff]  ;;  %s267_s1 = smov [#allocation3]  }
   0x6   :  { %139 = vperm.xlu0 %234, %v74_v3   ;;  %s209_s20 = sshll.u32 %s267_s1, 4  ;;  %s210_s20 = int_to_ptr.vmem [resolvable:$true] %s209_s20 }
   0x7   :  { %v92_v8 = vrot.slane %v91_v7, 4  ;;  %v78_v23 = vadd.s32 8, %v77_v20  ;;  %vm83_vm2 = vcmp.eq.s32.totalorder %v77_v20, %v226_v24  ;;  %s243_s22 = scalar_lea.vmem %s210_s20, 128  ;;  %p248_p1 = scmp.lt.s32.totalorder %s210_s20, %s210_s20 }
   0x8   :  { %v227_v30 = vsel %vm83_vm2, 1.0, %v266_v2  ;;  %p244_p0 = scmp.ne.s32.totalorder %s210_s20, %s243_s22  ;;  %p249_p2 = scmp.lt.s32.totalorder %s243_s22, %s243_s22 }
   0x9   :  { %v93_v9 = vmax.f32 %v91_v7, %v92_v8  ;;  %vm84_vm1 = vcmp.eq.s32.totalorder %v78_v23, %v226_v24  ;;  %v170_v8 = vand.u32 127, %v76_v18 }
   0xa   :  { %v228_v27 = vsel %vm84_vm1, 1.0, %v266_v2  ;;  %p250_p3 = por %p249_p2, %p248_p1 }
   0xb   :  { %v94_v10 = vrot.slane %v93_v9, 2  ;;  %vm174_vm3 = vcmp.lt.s32.totalorder %v170_v8, 8 }
   0xc   :  { %p251_p4 = pnand %p250_p3, %p244_p0 }
   0xd   :  { %v95_v11 = vmax.f32 %v93_v9, %v94_v10 }
   0xf   :  { %v96_v12 = vrot.slane %v95_v11, 1 }
  0x11   :  { %v97_v13 = vmax.f32 %v95_v11, %v96_v12 }
  0x13   :  { %v99_v14 = vsub.f32 %v72_v4, %v97_v13  ;;  %v98_v15 = vsub.f32 %v71_v5, %v97_v13  ;;  %v176_v13 = vld [vmem:[#allocation2] sm:$0x1] }
  0x15   :  { %v102_v16 = vmul.f32 1.442695, %v99_v14  ;;  %v100_v17 = vmul.f32 1.442695, %v98_v15  ;;  %v115_v36 = vmul.f32 %v228_v27, %v99_v14  ;;  %v114_v39 = vmul.f32 %v227_v30, %v98_v15 }
  0x17   :  { %235 = vpow2.f32 %v102_v16  ;;  %v116_v40 = vsel %vm89_vm0, %v115_v36, 0.0 }
  0x18   :  { %237 = vpow2.f32 %v100_v17  ;;  %v117_v43 = vadd.f32 %v116_v40, %v114_v39 }
  0x1a   :  { %v118_v45 = vrot.slane %v117_v43, 4 }
  0x1c   :  { %v119_v48 = vadd.f32 %v118_v45, %v117_v43 }
  0x1e   :  { %v120_v52 = vrot.slane %v119_v48, 2 }
  0x20   :  { %v121_v58 = vadd.f32 %v120_v52, %v119_v48 }
  0x22   :  { %v122_v62 = vrot.slane %v121_v58, 1 }
  0x24   :  { %v236_v19 = vpop.eup %235  ;;  %v123_v4 = vadd.f32 %v122_v62, %v121_v58 }
  0x25   :  { %v238_v21 = vpop.eup %237  ;;  %v104_v22 = vsel %vm89_vm0, %v236_v19, 0.0  ;;  %v126_v29 = vmul.f32 %v236_v19, %v228_v27 }
  0x26   :  { %v105_v25 = vadd.f32 %v238_v21, %v104_v22  ;;  %v125_v32 = vmul.f32 %v238_v21, %v227_v30 }
  0x27   :  { %v127_v33 = vsel %vm89_vm0, %v126_v29, 0.0 }
  0x28   :  { %v106_v26 = vrot.slane %v105_v25, 4  ;;  %v128_v35 = vadd.f32 %v127_v33, %v125_v32 }
  0x2a   :  { %v107_v28 = vadd.f32 %v106_v26, %v105_v25  ;;  %v129_v38 = vrot.slane %v128_v35, 4 }
  0x2c   :  { %v108_v31 = vrot.slane %v107_v28, 2  ;;  %v130_v42 = vadd.f32 %v129_v38, %v128_v35 }
  0x2e   :  { %v109_v34 = vadd.f32 %v108_v31, %v107_v28  ;;  %v131_v44 = vrot.slane %v130_v42, 2 }
  0x30   :  { %v110_v37 = vrot.slane %v109_v34, 1  ;;  %v132_v46 = vadd.f32 %v131_v44, %v130_v42 }
  0x32   :  { %v111_v41 = vadd.f32 %v110_v37, %v109_v34  ;;  %v133_v50 = vrot.slane %v132_v46, 1 }
  0x34   :  { %239 = vrcp.f32 %v111_v41  ;;  %v134_v55 = vadd.f32 %v133_v50, %v132_v46 }
  0x35   :  { %241 = vlog2.f32 %v111_v41 }
  0x41   :  { %v240_v57 = vpop.eup %239 }
  0x42   :  { %v136_v60 = vmul.f32 %v240_v57, %v134_v55  ;;  %v242_v0 = vpop.eup %241 }
  0x43   :  { %v113_v3 = vmul.f32 0.6931472, %v242_v0 }
  0x44   :  { %v157_v2 = vsub.f32 1.0, %v136_v60 }
  0x45   :  { %v124_v9 = vsub.f32 %v123_v4, %v113_v3 }
  0x46   :  { %v159_v7 = vmul.f32 %v157_v2, %v157_v2 }
  0x7d   :  { %v145_v47 = vpop.permute.xlu0 %144 }
  0x7e   :  { %v148_v49 = vmul.f32 %v228_v27, %v145_v47 }
  0x80   :  { %v149_v54 = vsel %vm89_vm0, %v148_v49, 0.0 }
  0x81   :  { %v140_v51 = vpop.permute.xlu0 %139 }
  0x82   :  { %v147_v53 = vmul.f32 %v227_v30, %v140_v51 }
  0x84   :  { %v150_v56 = vadd.f32 %v149_v54, %v147_v53 }
  0x86   :  { %v151_v59 = vrot.slane %v150_v56, 4 }
  0x88   :  { %v152_v61 = vadd.f32 %v151_v59, %v150_v56 }
  0x8a   :  { %v153_v63 = vrot.slane %v152_v61, 2 }
  0x8c   :  { %v154_v1 = vadd.f32 %v153_v63, %v152_v61 }
  0x8e   :  { %v155_v5 = vrot.slane %v154_v1, 1 }
  0x90   :  { %v156_v6 = vadd.f32 %v155_v5, %v154_v1 }
  0x92   :  { %v158_v10 = vsub.f32 0.0, %v156_v6 }
  0x94   :  { %v160_v11 = vmul.f32 %v159_v7, %v158_v10 }
  0x96   :  { %v161_v12 = vmul.f32 %v160_v11, %v124_v9 }
  0x98   :  { %v175_v14 = vsel %vm174_vm3, %v161_v12, 0.0 }
  0x99   :  { %v177_v15 = vadd.f32 %v176_v13, %v175_v14 }
  0x9b   :  { %178 = vst [vmem:[#allocation2] sm:$0x1] %v177_v15 }
  0xa2   :  { %v189_v16 = vld [vmem:[#allocation2] sm:$0x1] }
  0xa3   :  { %v191_v17 = vsel %vm190_vm4, %v189_v16, 0.0 }
  0xa4   :  { %192 = vadd.xlane.f32.xlu1 %v191_v17 }
 0x12d   :  { %v193_v19 = vpop.xlane.xlu1 %192 }
 0x12e   :  { %v194_v20 = vrot.slane %v193_v19, 4 }
 0x130   :  { %v195_v21 = vadd.f32 %v194_v20, %v193_v19 }
 0x132   :  { %v196_v22 = vrot.slane %v195_v21, 2 }
 0x134   :  { %v197_v23 = vadd.f32 %v196_v22, %v195_v21 }
 0x136   :  { %v198_v24 = vrot.slane %v197_v23, 1 }
 0x138   :  { %v199_v18 = vadd.f32 %v198_v24, %v197_v23 }
 0x13a   :  { %229 = vpush %v199_v18 }
 0x16b   :  { %s230_s21 = spop %229 }
 0x16c   :  { %v201_v25 = vstv %s230_s21 }
 0x16d   :  { %202 = vst [vmem:[#allocation3] sm:$0xff] %v201_v25 }
 0x16e   :  { %254 = shalt.err (!%p251_p4)
}
 0x16f   :  { %212 = dma.vmem_to_hbm [thread:$0]  %s210_s20, 128, %s314_s3, [#allocation4]  }
 0x170   :  { %263 = dma.done.wait [#allocation4], 128  }
 0x171   :  { %264 = vsyncadd [#allocation4], 4294967168 }
 0x172   :  { %216 = vsyncpa [#allocation4], 1 }

</bundles_post_ra>
